<compile_context>
chip_gen: v5e
topology: v5e:2x2
jax: 0.10.0
libtpu: 0.0.40
codegen_flags: <defaults>
</compile_context>

<pallas_src>
import jax
import jax.numpy as jnp
from jax.experimental import pallas as pl
from jax.experimental.pallas import tpu as pltpu


def _my_add_kernel(a_ref, b_ref, o_ref):
    # Elementwise on the VPU: out = 2*a + b (weak-typed 2 preserves dtype).
    o_ref[...] = a_ref[...] * 2 + b_ref[...]


_BLOCK_BYTES = 4 * 1024 * 1024        # ~4 MiB per-array block
_VMEM_LIMIT_BYTES = 32 * 1024 * 1024  # 24 MiB resident + headroom, OK on all gens
_MIN_PALLAS_BYTES = 256 * 1024        # below this, fused XLA elementwise wins


def _sublane_multiple(dtype) -> int:
    """Packed sublane multiple: 8 for 4-byte, 16 for 2-byte, 32 for 1-byte."""
    itemsize = jnp.dtype(dtype).itemsize
    if itemsize <= 4:
        return max(8, (8 * 4) // itemsize)
    return 8


def _run_pallas_2d(a2d: jax.Array, b2d: jax.Array) -> jax.Array:
    """Streaming 2*a + b on a lane-dense (rows, lanes) slab."""
    rows, lanes = a2d.shape
    dtype = a2d.dtype
    itemsize = jnp.dtype(dtype).itemsize
    sub = _sublane_multiple(dtype)

    # ~4 MiB per-array blocks, rounded to the packed sublane multiple.
    target_rows = max(sub, _BLOCK_BYTES // (lanes * itemsize))
    target_rows = (target_rows // sub) * sub

    # Ensure at least 2 blocks whenever rows allow, so both v7x TensorCores
    # stream (a single block would leave one TC idle).
    half_rounded = ((pl.cdiv(rows, 2) + sub - 1) // sub) * sub
    tile_rows = min(target_rows, half_rounded)
    if tile_rows >= rows:
        tile_rows = rows  # full-extent block is always legal

    grid = (pl.cdiv(rows, tile_rows),)  # partial last block is masked by Pallas

    return pl.pallas_call(
        _my_add_kernel,
        out_shape=jax.ShapeDtypeStruct((rows, lanes), dtype),
        grid_spec=pltpu.PrefetchScalarGridSpec(
            num_scalar_prefetch=0,
            grid=grid,
            in_specs=[
                pl.BlockSpec((tile_rows, lanes), lambda i: (i, 0)),
                pl.BlockSpec((tile_rows, lanes), lambda i: (i, 0)),
            ],
            out_specs=pl.BlockSpec((tile_rows, lanes), lambda i: (i, 0)),
        ),
        compiler_params=pltpu.CompilerParams(
            dimension_semantics=("parallel",),
            vmem_limit_bytes=_VMEM_LIMIT_BYTES,
        ),
    )(a2d, b2d)


def my_add(a: jax.Array, b: jax.Array, *, min_pallas_bytes: int = _MIN_PALLAS_BYTES
           ) -> jax.Array:
    """Pallas implementation of MyAdd.forward: returns 2*a + b elementwise."""
    assert a.shape == b.shape, "MyAdd expects same-shaped inputs"
    assert a.dtype == b.dtype
    orig_shape = a.shape
    n = a.size
    itemsize = jnp.dtype(a.dtype).itemsize

    # Small-input bypass: a fused XLA elementwise op beats the kernel launch
    # cost for tiny tensors; the Pallas path only pays off at HBM-stream size.
    if n * itemsize < min_pallas_bytes or n < 128:
        return a * 2 + b

    if n % 128 == 0:
        # Widest lane-dense slab width dividing the element count so stores
        # are unmasked vst and the reshape is metadata-only (zero copy).
        lanes = 128
        for cand in (1024, 512, 256, 128):
            if n % cand == 0:
                lanes = cand
                break
        rows = n // lanes
        out2d = _run_pallas_2d(a.reshape(rows, lanes), b.reshape(rows, lanes))
        return out2d.reshape(orig_shape)

    # Rare fallback (element count not a multiple of 128): run the kernel on
    # the 128-aligned prefix and compute the <128-element tail in plain jnp.
    # No jnp.pad of both full inputs and no full-output [:n] slice.
    n_main = (n // 128) * 128
    a_flat = a.reshape(-1)
    b_flat = b.reshape(-1)
    rows = n_main // 128
    out_main = _run_pallas_2d(
        a_flat[:n_main].reshape(rows, 128),
        b_flat[:n_main].reshape(rows, 128),
    ).reshape(-1)
    out_tail = a_flat[n_main:] * 2 + b_flat[n_main:]
    return jnp.concatenate([out_main, out_tail]).reshape(orig_shape)


if __name__ == "__main__":
    key = jax.random.PRNGKey(0)
    ka, kb, kc, kd, ke, kf = jax.random.split(key, 6)

    # 1) Small NCHW demo shape (batch=2, channels=4, 16x16): small-input bypass.
    a0 = jax.random.normal(ka, (2, 4, 16, 16), dtype=jnp.float32)
    b0 = jax.random.normal(kb, (2, 4, 16, 16), dtype=jnp.float32)
    out0 = jax.block_until_ready(my_add(a0, b0))
    assert out0.shape == a0.shape and out0.dtype == a0.dtype
    assert jnp.allclose(out0, 2.0 * a0 + b0, atol=1e-6, rtol=1e-6)

    # 2) Same small shape, forced through the Pallas kernel path.
    out0k = jax.block_until_ready(my_add(a0, b0, min_pallas_bytes=0))
    assert jnp.allclose(out0k, 2.0 * a0 + b0, atol=1e-6, rtol=1e-6)

    # 3) Moderately sized, 128-aligned -> streaming Pallas path, 2-block grid.
    a1 = jax.random.normal(kc, (8, 4, 64, 128), dtype=jnp.float32)
    b1 = jax.random.normal(kd, (8, 4, 64, 128), dtype=jnp.float32)
    out1 = jax.block_until_ready(my_add(a1, b1))
    assert jnp.allclose(out1, 2.0 * a1 + b1, atol=1e-6, rtol=1e-6)

    # 4) Element count not a multiple of 128 -> prefix kernel + jnp tail.
    a2 = jax.random.normal(ke, (127, 1031), dtype=jnp.float32)
    b2 = jax.random.normal(kf, (127, 1031), dtype=jnp.float32)
    out2 = jax.block_until_ready(my_add(a2, b2))
    assert jnp.allclose(out2, 2.0 * a2 + b2, atol=1e-6, rtol=1e-6)

    print("KERNEL_OK")
</pallas_src>

<mosaic_0001>
module attributes {stable_mosaic.version = 11 : i64} {
  func.func @_my_add_kernel(%arg0: i32, %arg1: memref<2x1024xf32, #tpu.memory_space<vmem>>, %arg2: memref<2x1024xf32, #tpu.memory_space<vmem>>, %arg3: memref<2x1024xf32, #tpu.memory_space<vmem>>) attributes {dimension_semantics = [#tpu.dimension_semantics<parallel>], iteration_bounds = array<i64: 1>, scalar_prefetch = 0 : i64, scratch_operands = 0 : i64, tpu.core_type = #tpu.core_type<tc>, window_params = [{transform_indices = @transform_0, window_bounds = array<i64: 2, 1024>}, {transform_indices = @transform_1, window_bounds = array<i64: 2, 1024>}, {transform_indices = @transform_2, window_bounds = array<i64: 2, 1024>}]} {
    %c0 = arith.constant 0 : index
    %c0_0 = arith.constant 0 : index
    %0 = vector.load %arg1[%c0, %c0_0] : memref<2x1024xf32, #tpu.memory_space<vmem>>, vector<2x1024xf32>
    %cst = arith.constant 2.000000e+00 : f32
    %1 = vector.broadcast %cst : f32 to vector<2x1024xf32>
    %2 = arith.mulf %0, %1 : vector<2x1024xf32>
    %c0_1 = arith.constant 0 : index
    %c0_2 = arith.constant 0 : index
    %3 = vector.load %arg2[%c0_1, %c0_2] : memref<2x1024xf32, #tpu.memory_space<vmem>>, vector<2x1024xf32>
    %4 = arith.addf %2, %3 : vector<2x1024xf32>
    %c0_3 = arith.constant 0 : index
    %c0_4 = arith.constant 0 : index
    %5 = vector.load %arg3[%c0_3, %c0_4] : memref<2x1024xf32, #tpu.memory_space<vmem>>, vector<2x1024xf32>
    tpu.vector_store %arg3[%c0_3, %c0_4], %4 {strides = array<i32>} : memref<2x1024xf32, #tpu.memory_space<vmem>>, vector<2x1024xf32>,
    return
  }
  func.func @transform_0(%arg0: i32) -> (i32, i32) {
    %c0_i32 = arith.constant 0 : i32
    %c0_i32_0 = arith.constant 0 : i32
    return %arg0, %c0_i32 : i32, i32
  }
  func.func @transform_1(%arg0: i32) -> (i32, i32) {
    %c0_i32 = arith.constant 0 : i32
    %c0_i32_0 = arith.constant 0 : i32
    return %arg0, %c0_i32 : i32, i32
  }
  func.func @transform_2(%arg0: i32) -> (i32, i32) {
    %c0_i32 = arith.constant 0 : i32
    %c0_i32_0 = arith.constant 0 : i32
    return %arg0, %c0_i32 : i32, i32
  }
}

</mosaic_0001>

<bundles_post_ra>
// kernel: tpu_custom_call.1
= control target key start
LH: loop header
LB: loop body
LE: loop exit
PB: predicated region body
PF: predicated region fallthrough
CT: control target
= control target key end

     0   :  { %7 = vsyncpa [#allocation3], 0  ;;  %s176_s0 = inlined_call_operand.hbm [shape: f32[2,1024], index: 0, kind: input, shape index: {}]   ;;  %s177_s1 = inlined_call_operand.hbm [shape: f32[2,1024], index: 1, kind: input, shape index: {}]   ;;  %s178_s2 = inlined_call_operand.hbm [shape: f32[2,1024], index: 2, kind: output, shape index: {}]  }
   0x1   :  { %8 = vsyncpa [#allocation6], 0 }
   0x2   :  { %9 = vsyncpa [#allocation4], 0  ;;  %s15_s11 = sshll.u32 %s176_s0, 4  ;;  %s149_s12 = smov [#allocation2]   ;;  %s16_s11 = int_to_ptr.hbm [resolvable:$true] %s15_s11 }
   0x3   :  { %s17_s13 = sshll.u32 %s149_s12, 4  ;;  %s26_s16 = sshll.u32 %s177_s1, 4  ;;  %s18_s13 = int_to_ptr.vmem [resolvable:$true] %s17_s13  ;;  %s27_s16 = int_to_ptr.hbm [resolvable:$true] %s26_s16 }
   0x4   :  { %20 = dma.hbm_to_vmem [thread:$0]  %s16_s11, 256, %s18_s13, [#allocation3]  }
   0x5   :  { %s150_s17 = smov [#allocation5]  }
   0x6   :  { %s28_s18 = sshll.u32 %s150_s17, 4  ;;  %s29_s18 = int_to_ptr.vmem [resolvable:$true] %s28_s18 }
   0x7   :  { %31 = dma.hbm_to_vmem [thread:$0]  %s27_s16, 256, %s29_s18, [#allocation6]  }
   0x8   :  { %143 = dma.done.wait [#allocation3], 256  }
   0x9   :  { %144 = vsyncadd [#allocation3], 4294967040 }
   0xa   :  { %145 = dma.done.wait [#allocation6], 256  }
   0xb   :  { %146 = vsyncadd [#allocation6], 4294967040  ;;  %v40_v0 = vld [vmem:[#allocation2] sm:$0xff]  ;;  %v44_v1 = vld [vmem:[#allocation5] sm:$0xff]  ;;  %s151_s0 = smov [#allocation7]   ;;  %s57_s21 = sshll.u32 %s178_s2, 4  ;;  %s58_s21 = int_to_ptr.hbm [resolvable:$true] %s57_s21 }
   0xc   :  { %v41_v2 = vld [vmem:[#allocation2 + $0x8] sm:$0xff]  ;;  %v42_v3 = vmul.f32 2.0, %v40_v0  ;;  %v45_v5 = vld [vmem:[#allocation5 + $0x8] sm:$0xff]  ;;  %s55_s19 = sshll.u32 %s151_s0, 4  ;;  %s56_s19 = int_to_ptr.vmem [resolvable:$true] %s55_s19 }
   0xd   :  { %v43_v4 = vmul.f32 2.0, %v41_v2 }
   0xe   :  { %v46_v6 = vadd.f32 %v44_v1, %v42_v3 }
   0xf   :  { %v47_v7 = vadd.f32 %v45_v5, %v43_v4 }
  0x10   :  { %48 = vst [vmem:[#allocation7] sm:$0xff] %v46_v6 }
  0x11   :  { %49 = vst [vmem:[#allocation7 + $0x8] sm:$0xff] %v47_v7 }
  0x12   :  { %60 = dma.vmem_to_hbm [thread:$0]  %s56_s19, 256, %s58_s21, [#allocation4]  }
  0x13   :  { %147 = dma.done.wait [#allocation4], 256  }
  0x14   :  { %148 = vsyncadd [#allocation4], 4294967040 }
  0x15   :  { %65 = vsyncpa [#allocation3], 1 }
  0x16   :  { %66 = vsyncpa [#allocation6], 1 }
  0x17   :  { %67 = vsyncpa [#allocation4], 1 }

</bundles_post_ra>
